<compile_context>
chip_gen: v6e
topology: v6e:2x2x1
jax: 0.10.0
libtpu: 0.0.40
codegen_flags: <defaults>
</compile_context>

<pallas_src>
import math
from functools import partial

import jax
import jax.numpy as jnp
from jax.experimental import pallas as pl
from jax.experimental.pallas import tpu as pltpu


# ---------------------------------------------------------------------------
# Kernel 1: K / V projection, tiled over (batch, T2).  Runs once per input row.
# ---------------------------------------------------------------------------
def _kv_proj_kernel(k_ref, v_ref, wk_ref, bk_ref, wv_ref, bv_ref, kp_ref, vp_ref):
    f32 = jnp.float32
    kp_ref[0] = (jnp.dot(k_ref[0], wk_ref[...], preferred_element_type=f32)
                 + bk_ref[...]).astype(kp_ref.dtype)
    vp_ref[0] = (jnp.dot(v_ref[0], wv_ref[...], preferred_element_type=f32)
                 + bv_ref[...]).astype(vp_ref.dtype)


# ---------------------------------------------------------------------------
# Kernel 2: Q projection + per-head attention + output projection per
#           (batch, query-tile) grid point.  K/V arrive already projected.
# ---------------------------------------------------------------------------
def _attn_kernel(q_ref, kp_ref, vp_ref, mask_ref,
                 wq_ref, bq_ref, wo_ref, bo_ref,
                 out_ref, ctx_ref, *, n_head, d_k):
    f32 = jnp.float32
    bf16 = jnp.bfloat16

    # Query projection for this tile (1/sqrt(d_k) already folded into wq/bq).
    q = (jnp.dot(q_ref[0], wq_ref[...], preferred_element_type=f32)
         + bq_ref[...]).astype(bf16)                       # (tq, F)

    k = kp_ref[0]                                          # (T2, F) bf16, pre-projected
    v = vp_ref[0]                                          # (T2, F) bf16, pre-projected

    # Mask prep (once per grid step, T2-sized): additive bias + keep multiply.
    masked = mask_ref[0] == 0                              # (1, T2) bool
    neg_big = jnp.finfo(f32).min
    score_bias = jnp.where(masked, neg_big, 0.0).astype(f32)   # ~ masked_fill(min)
    keep = jnp.where(masked, 0.0, 1.0).astype(f32)              # masked_fill(0.0)

    trans_b = (((1,), (1,)), ((), ()))   # contract last dims: q_h @ k_h^T, no .T
    for h in range(n_head):
        sl = slice(h * d_k, (h + 1) * d_k)
        q_h = q[:, sl]                   # (tq, d_k) bf16
        k_h = k[:, sl]                   # (T2, d_k) bf16
        v_h = v[:, sl]                   # (T2, d_k) bf16

        scores = jax.lax.dot_general(q_h, k_h, trans_b,
                                     preferred_element_type=f32)    # (tq, T2)
        scores = scores + score_bias

        m = jnp.max(scores, axis=-1, keepdims=True)
        e = jnp.exp(scores - m)
        denom = jnp.sum(e, axis=-1, keepdims=True)
        attn = e * pl.reciprocal(denom, approx=True)                 # EUP vrcp
        attn = attn * keep                                           # zero masked cols

        # Padded query rows (T1 % tq != 0) only ever affect their own rows and
        # are dropped on writeback of the partial output block.
        ctx_ref[:, sl] = jnp.dot(attn.astype(bf16), v_h,
                                 preferred_element_type=f32).astype(bf16)

    # Output projection: one dense (tq, F) @ (F, F) matmul from bf16 ctx.
    out = jnp.dot(ctx_ref[...], wo_ref[...],
                  preferred_element_type=f32) + bo_ref[...]
    out_ref[0] = out.astype(out_ref.dtype)


def multi_headed_attention(query, key, value, mask, params, n_head,
                           *, q_tile=128, kv_proj_tile=256):
    """Pallas-backed forward of MultiHeadedAttention.

    query: (B, T1, F), key/value: (B, T2, F), mask: (B, 1, T2) int (1 = keep).
    params: dict with wq, bq, wk, bk, wv, bv, wo, bo in nn.Linear layout
    (W is (out_features, in_features)).  Returns (B, T1, F) in query.dtype.
    Note: on v6e (128 MiB VMEM) q_tile=256 is a good choice; keep 128 on v7x.
    """
    B, T1, F = query.shape
    _, T2, _ = key.shape
    assert F % n_head == 0
    d_k = F // n_head
    inv_sqrt_dk = 1.0 / math.sqrt(d_k)

    cdt = jnp.bfloat16           # MXU operand dtype
    out_dtype = query.dtype
    out_size = jnp.dtype(out_dtype).itemsize

    # Pre-transpose weights once (kernel computes x @ W, no in-kernel .T),
    # fold the attention scale into the Q projection (weight AND bias),
    # and cast weights to bf16 (halves weight DMA, 2x MXU throughput).
    wq = (params["wq"] * inv_sqrt_dk).T.astype(cdt)
    wk = params["wk"].T.astype(cdt)
    wv = params["wv"].T.astype(cdt)
    wo = params["wo"].T.astype(cdt)
    bq = (params["bq"] * inv_sqrt_dk).reshape(1, F).astype(jnp.float32)
    bk = params["bk"].reshape(1, F).astype(jnp.float32)
    bv = params["bv"].reshape(1, F).astype(jnp.float32)
    bo = params["bo"].reshape(1, F).astype(jnp.float32)

    # Cast activations in the wrapper: bf16 DMA for the large (T2, F) slabs.
    q_bf = query.astype(cdt)
    k_bf = key.astype(cdt)
    v_bf = value.astype(cdt)
    mask_i = mask.astype(jnp.int32)

    tq = min(T1, q_tile)
    tkv = min(T2, kv_proj_tile)

    def run(single_buffer):
        # Single-buffer batch-invariant operands (constant block index) to save
        # VMEM; fall back to default double-buffering if unsupported.
        cm = dict(pipeline_mode=pl.Buffered(1)) if single_buffer else {}
        nbuf = 1 if single_buffer else 2

        # ------------------ pass 1: project K and V once -------------------
        proj_vmem = int(
            2 * 2 * (tkv * F * 2)                    # k/v input tiles, 2 bufs
            + 2 * 2 * (tkv * F * 2)                  # kp/vp output tiles, 2 bufs
            + nbuf * 2 * (F * F * 2 + F * 4)         # wk/bk, wv/bv
            + 4 * tkv * F * 4                        # f32 temporaries headroom
            + (2 << 20))
        proj_vmem = min(max(proj_vmem, 8 << 20), 64 << 20)

        kp, vp = pl.pallas_call(
            _kv_proj_kernel,
            out_shape=(jax.ShapeDtypeStruct((B, T2, F), cdt),
                       jax.ShapeDtypeStruct((B, T2, F), cdt)),
            grid_spec=pltpu.PrefetchScalarGridSpec(
                num_scalar_prefetch=0,
                grid=(B, pl.cdiv(T2, tkv)),
                in_specs=[
                    pl.BlockSpec((1, tkv, F), lambda b, j: (b, j, 0)),   # key
                    pl.BlockSpec((1, tkv, F), lambda b, j: (b, j, 0)),   # value
                    pl.BlockSpec((F, F), lambda b, j: (0, 0), **cm),     # wk
                    pl.BlockSpec((1, F), lambda b, j: (0, 0), **cm),     # bk
                    pl.BlockSpec((F, F), lambda b, j: (0, 0), **cm),     # wv
                    pl.BlockSpec((1, F), lambda b, j: (0, 0), **cm),     # bv
                ],
                out_specs=(pl.BlockSpec((1, tkv, F), lambda b, j: (b, j, 0)),
                           pl.BlockSpec((1, tkv, F), lambda b, j: (b, j, 0))),
            ),
            compiler_params=pltpu.CompilerParams(
                dimension_semantics=("parallel", "parallel"),
                vmem_limit_bytes=proj_vmem),
        )(k_bf, v_bf, wk, bk, wv, bv)

        # ------------------ pass 2: fused attention ------------------------
        attn_vmem = int(
            2 * tq * F * 2                           # query tile, 2 bufs
            + 2 * tq * F * out_size                  # output tile, 2 bufs
            + nbuf * 2 * (T2 * F * 2)                # projected K + V slabs
            + nbuf * T2 * 4                          # mask
            + nbuf * 2 * (F * F * 2 + F * 4)         # wq/bq, wo/bo
            + tq * F * 2                             # ctx scratch (bf16)
            + 4 * tq * T2 * 4                        # f32 score temporaries
            + (4 << 20))                             # slack
        attn_vmem = min(max(attn_vmem, 8 << 20), 64 << 20)

        kernel = partial(_attn_kernel, n_head=n_head, d_k=d_k)
        return pl.pallas_call(
            kernel,
            out_shape=jax.ShapeDtypeStruct((B, T1, F), out_dtype),
            grid_spec=pltpu.PrefetchScalarGridSpec(
                num_scalar_prefetch=0,
                grid=(B, pl.cdiv(T1, tq)),
                in_specs=[
                    pl.BlockSpec((1, tq, F), lambda b, i: (b, i, 0)),        # query tile
                    pl.BlockSpec((1, T2, F), lambda b, i: (b, 0, 0), **cm),  # proj K
                    pl.BlockSpec((1, T2, F), lambda b, i: (b, 0, 0), **cm),  # proj V
                    pl.BlockSpec((1, 1, T2), lambda b, i: (b, 0, 0), **cm),  # mask
                    pl.BlockSpec((F, F), lambda b, i: (0, 0), **cm),         # wq
                    pl.BlockSpec((1, F), lambda b, i: (0, 0), **cm),         # bq
                    pl.BlockSpec((F, F), lambda b, i: (0, 0), **cm),         # wo
                    pl.BlockSpec((1, F), lambda b, i: (0, 0), **cm),         # bo
                ],
                out_specs=pl.BlockSpec((1, tq, F), lambda b, i: (b, i, 0)),
                scratch_shapes=[pltpu.VMEM((tq, F), cdt)],                   # ctx (bf16)
            ),
            compiler_params=pltpu.CompilerParams(
                dimension_semantics=("parallel", "parallel"),
                vmem_limit_bytes=attn_vmem),
        )(q_bf, kp, vp, mask_i, wq, bq, wo, bo)

    try:
        return run(single_buffer=True)
    except Exception:
        # pipeline_mode=pl.Buffered(1) not supported on this build: use the
        # default double-buffered specs (correctness is identical).
        return run(single_buffer=False)


def _reference_mha(query, key, value, mask, params, n_head,
                   matmul_dtype=jnp.bfloat16):
    """Pure-JAX reference replicating the PyTorch forward structure exactly.

    Matmul operands are rounded to `matmul_dtype` (with f32 accumulation) to
    mirror the kernel's bf16 MXU precision; pass jnp.float32 for a full-f32
    reference.
    """
    B, T1, F = query.shape
    d_k = F // n_head
    md = matmul_dtype

    def lin(x, w, b):
        return jnp.einsum("btf,of->bto", x.astype(md), w.astype(md),
                          preferred_element_type=jnp.float32) + b

    q = lin(query, params["wq"], params["bq"]).reshape(B, T1, n_head, d_k).transpose(0, 2, 1, 3)
    k = lin(key, params["wk"], params["bk"]).reshape(B, -1, n_head, d_k).transpose(0, 2, 1, 3)
    v = lin(value, params["wv"], params["bv"]).reshape(B, -1, n_head, d_k).transpose(0, 2, 1, 3)

    scores = jnp.einsum("bhqd,bhkd->bhqk", q.astype(md), k.astype(md),
                        preferred_element_type=jnp.float32) / math.sqrt(d_k)
    m = (mask[:, None, :, :] == 0)                        # (B,1,1,T2)
    min_value = jnp.finfo(jnp.float32).min
    scores = jnp.where(m, min_value, scores)
    attn = jax.nn.softmax(scores, axis=-1)
    attn = jnp.where(m, 0.0, attn)
    x = jnp.einsum("bhqk,bhkd->bhqd", attn.astype(md), v.astype(md),
                   preferred_element_type=jnp.float32)
    x = x.transpose(0, 2, 1, 3).reshape(B, T1, F)
    return jnp.einsum("btf,of->bto", x.astype(md), params["wo"].astype(md),
                      preferred_element_type=jnp.float32) + params["bo"]


if __name__ == "__main__":
    # Small shapes consistent with the module: batch=2, time=8, n_feat=32, heads=4.
    B, T1, T2, F, H = 2, 8, 8, 32, 4

    key0 = jax.random.PRNGKey(0)
    keys = jax.random.split(key0, 12)

    scale = 1.0 / math.sqrt(F)
    params = {
        "wq": jax.random.normal(keys[0], (F, F), jnp.float32) * scale,
        "bq": jax.random.normal(keys[1], (F,), jnp.float32) * 0.1,
        "wk": jax.random.normal(keys[2], (F, F), jnp.float32) * scale,
        "bk": jax.random.normal(keys[3], (F,), jnp.float32) * 0.1,
        "wv": jax.random.normal(keys[4], (F, F), jnp.float32) * scale,
        "bv": jax.random.normal(keys[5], (F,), jnp.float32) * 0.1,
        "wo": jax.random.normal(keys[6], (F, F), jnp.float32) * scale,
        "bo": jax.random.normal(keys[7], (F,), jnp.float32) * 0.1,
    }

    query = jax.random.normal(keys[8], (B, T1, F), jnp.float32)
    k_in = jax.random.normal(keys[9], (B, T2, F), jnp.float32)
    v_in = jax.random.normal(keys[10], (B, T2, F), jnp.float32)
    # Mask: (B, 1, T2), last two key positions of batch 1 are masked out.
    mask = jnp.ones((B, 1, T2), jnp.int32)
    mask = mask.at[1, 0, -2:].set(0)

    out = multi_headed_attention(query, k_in, v_in, mask, params, H)
    out = jax.block_until_ready(out)

    ref = _reference_mha(query, k_in, v_in, mask, params, H)
    assert out.shape == (B, T1, F)
    # Kernel uses bf16 MXU operands + approx EUP reciprocal; the reference mirrors
    # the bf16 operand rounding, so tolerance only needs to cover the approximate
    # reciprocal / scale-folding / accumulation-order differences.
    assert jnp.allclose(out, ref, atol=5e-2, rtol=5e-2), "mismatch vs reference"

    print("KERNEL_OK")
</pallas_src>

<mosaic_0001>
module attributes {stable_mosaic.version = 11 : i64} {
  func.func @_kv_proj_kernel(%arg0: i32, %arg1: i32, %arg2: memref<1x8x32xbf16, #tpu.memory_space<vmem>>, %arg3: memref<1x8x32xbf16, #tpu.memory_space<vmem>>, %arg4: memref<32x32xbf16, #tpu.memory_space<vmem>>, %arg5: memref<1x32xf32, #tpu.memory_space<vmem>>, %arg6: memref<32x32xbf16, #tpu.memory_space<vmem>>, %arg7: memref<1x32xf32, #tpu.memory_space<vmem>>, %arg8: memref<1x8x32xbf16, #tpu.memory_space<vmem>>, %arg9: memref<1x8x32xbf16, #tpu.memory_space<vmem>>) attributes {dimension_semantics = [#tpu.dimension_semantics<parallel>, #tpu.dimension_semantics<parallel>], iteration_bounds = array<i64: 2, 1>, scalar_prefetch = 0 : i64, scratch_operands = 0 : i64, tpu.core_type = #tpu.core_type<tc>, window_params = [{transform_indices = @transform_0, window_bounds = array<i64: 1, 8, 32>}, {transform_indices = @transform_1, window_bounds = array<i64: 1, 8, 32>}, {pipeline_mode = #tpu.pipeline_mode<synchronous>, transform_indices = @transform_2, window_bounds = array<i64: 32, 32>}, {pipeline_mode = #tpu.pipeline_mode<synchronous>, transform_indices = @transform_3, window_bounds = array<i64: 1, 32>}, {pipeline_mode = #tpu.pipeline_mode<synchronous>, transform_indices = @transform_4, window_bounds = array<i64: 32, 32>}, {pipeline_mode = #tpu.pipeline_mode<synchronous>, transform_indices = @transform_5, window_bounds = array<i64: 1, 32>}, {transform_indices = @transform_6, window_bounds = array<i64: 1, 8, 32>}, {transform_indices = @transform_7, window_bounds = array<i64: 1, 8, 32>}]} {
    %c0 = arith.constant 0 : index
    %c0_0 = arith.constant 0 : index
    %c0_1 = arith.constant 0 : index
    %0 = vector.load %arg2[%c0, %c0_0, %c0_1] : memref<1x8x32xbf16, #tpu.memory_space<vmem>>, vector<1x8x32xbf16>
    %1 = vector.shape_cast %0 : vector<1x8x32xbf16> to vector<8x32xbf16>
    %c0_2 = arith.constant 0 : index
    %c0_3 = arith.constant 0 : index
    %2 = vector.load %arg4[%c0_2, %c0_3] : memref<32x32xbf16, #tpu.memory_space<vmem>>, vector<32x32xbf16>
    %cst = arith.constant dense<0.000000e+00> : vector<8x32xf32>
    %3 = tpu.matmul %1, %2, %cst {dimension_numbers = #tpu.dot_dimension_numbers<[1], [0], [0], [1], [0, 0, 1, 1], [], []>} : vector<8x32xbf16>, vector<32x32xbf16>, vector<8x32xf32> -> vector<8x32xf32>
    %c0_4 = arith.constant 0 : index
    %c0_5 = arith.constant 0 : index
    %4 = vector.load %arg5[%c0_4, %c0_5] : memref<1x32xf32, #tpu.memory_space<vmem>>, vector<1x32xf32>
    %5 = vector.broadcast %4 : vector<1x32xf32> to vector<8x32xf32>
    %6 = arith.addf %3, %5 : vector<8x32xf32>
    %7 = arith.truncf %6 : vector<8x32xf32> to vector<8x32xbf16>
    %c0_6 = arith.constant 0 : index
    %c0_7 = arith.constant 0 : index
    %c0_8 = arith.constant 0 : index
    %8 = vector.load %arg8[%c0_6, %c0_7, %c0_8] : memref<1x8x32xbf16, #tpu.memory_space<vmem>>, vector<1x8x32xbf16>
    %9 = vector.shape_cast %8 : vector<1x8x32xbf16> to vector<8x32xbf16>
    %10 = vector.shape_cast %7 : vector<8x32xbf16> to vector<1x8x32xbf16>
    tpu.vector_store %arg8[%c0_6, %c0_7, %c0_8], %10 {strides = array<i32>} : memref<1x8x32xbf16, #tpu.memory_space<vmem>>, vector<1x8x32xbf16>,
    %c0_9 = arith.constant 0 : index
    %c0_10 = arith.constant 0 : index
    %c0_11 = arith.constant 0 : index
    %11 = vector.load %arg3[%c0_9, %c0_10, %c0_11] : memref<1x8x32xbf16, #tpu.memory_space<vmem>>, vector<1x8x32xbf16>
    %12 = vector.shape_cast %11 : vector<1x8x32xbf16> to vector<8x32xbf16>
    %c0_12 = arith.constant 0 : index
    %c0_13 = arith.constant 0 : index
    %13 = vector.load %arg6[%c0_12, %c0_13] : memref<32x32xbf16, #tpu.memory_space<vmem>>, vector<32x32xbf16>
    %cst_14 = arith.constant dense<0.000000e+00> : vector<8x32xf32>
    %14 = tpu.matmul %12, %13, %cst_14 {dimension_numbers = #tpu.dot_dimension_numbers<[1], [0], [0], [1], [0, 0, 1, 1], [], []>} : vector<8x32xbf16>, vector<32x32xbf16>, vector<8x32xf32> -> vector<8x32xf32>
    %c0_15 = arith.constant 0 : index
    %c0_16 = arith.constant 0 : index
    %15 = vector.load %arg7[%c0_15, %c0_16] : memref<1x32xf32, #tpu.memory_space<vmem>>, vector<1x32xf32>
    %16 = vector.broadcast %15 : vector<1x32xf32> to vector<8x32xf32>
    %17 = arith.addf %14, %16 : vector<8x32xf32>
    %18 = arith.truncf %17 : vector<8x32xf32> to vector<8x32xbf16>
    %c0_17 = arith.constant 0 : index
    %c0_18 = arith.constant 0 : index
    %c0_19 = arith.constant 0 : index
    %19 = vector.load %arg9[%c0_17, %c0_18, %c0_19] : memref<1x8x32xbf16, #tpu.memory_space<vmem>>, vector<1x8x32xbf16>
    %20 = vector.shape_cast %19 : vector<1x8x32xbf16> to vector<8x32xbf16>
    %21 = vector.shape_cast %18 : vector<8x32xbf16> to vector<1x8x32xbf16>
    tpu.vector_store %arg9[%c0_17, %c0_18, %c0_19], %21 {strides = array<i32>} : memref<1x8x32xbf16, #tpu.memory_space<vmem>>, vector<1x8x32xbf16>,
    return
  }
  func.func @transform_0(%arg0: i32, %arg1: i32) -> (i32, i32, i32) {
    %c0_i32 = arith.constant 0 : i32
    %c0_i32_0 = arith.constant 0 : i32
    return %arg0, %arg1, %c0_i32 : i32, i32, i32
  }
  func.func @transform_1(%arg0: i32, %arg1: i32) -> (i32, i32, i32) {
    %c0_i32 = arith.constant 0 : i32
    %c0_i32_0 = arith.constant 0 : i32
    return %arg0, %arg1, %c0_i32 : i32, i32, i32
  }
  func.func @transform_2(%arg0: i32, %arg1: i32) -> (i32, i32) {
    %c0_i32 = arith.constant 0 : i32
    %c0_i32_0 = arith.constant 0 : i32
    %c0_i32_1 = arith.constant 0 : i32
    return %c0_i32, %c0_i32_0 : i32, i32
  }
  func.func @transform_3(%arg0: i32, %arg1: i32) -> (i32, i32) {
    %c0_i32 = arith.constant 0 : i32
    %c0_i32_0 = arith.constant 0 : i32
    %c0_i32_1 = arith.constant 0 : i32
    return %c0_i32, %c0_i32_0 : i32, i32
  }
  func.func @transform_4(%arg0: i32, %arg1: i32) -> (i32, i32) {
    %c0_i32 = arith.constant 0 : i32
    %c0_i32_0 = arith.constant 0 : i32
    %c0_i32_1 = arith.constant 0 : i32
    return %c0_i32, %c0_i32_0 : i32, i32
  }
  func.func @transform_5(%arg0: i32, %arg1: i32) -> (i32, i32) {
    %c0_i32 = arith.constant 0 : i32
    %c0_i32_0 = arith.constant 0 : i32
    %c0_i32_1 = arith.constant 0 : i32
    return %c0_i32, %c0_i32_0 : i32, i32
  }
  func.func @transform_6(%arg0: i32, %arg1: i32) -> (i32, i32, i32) {
    %c0_i32 = arith.constant 0 : i32
    %c0_i32_0 = arith.constant 0 : i32
    return %arg0, %arg1, %c0_i32 : i32, i32, i32
  }
  func.func @transform_7(%arg0: i32, %arg1: i32) -> (i32, i32, i32) {
    %c0_i32 = arith.constant 0 : i32
    %c0_i32_0 = arith.constant 0 : i32
    return %arg0, %arg1, %c0_i32 : i32, i32, i32
  }
}

module attributes {stable_mosaic.version = 11 : i64} {
  func.func @_kv_proj_kernel(%arg0: i32, %arg1: i32, %arg2: memref<1x8x32xbf16, #tpu.memory_space<vmem>>, %arg3: memref<1x8x32xbf16, #tpu.memory_space<vmem>>, %arg4: memref<32x32xbf16, #tpu.memory_space<vmem>>, %arg5: memref<1x32xf32, #tpu.memory_space<vmem>>, %arg6: memref<32x32xbf16, #tpu.memory_space<vmem>>, %arg7: memref<1x32xf32, #tpu.memory_space<vmem>>, %arg8: memref<1x8x32xbf16, #tpu.memory_space<vmem>>, %arg9: memref<1x8x32xbf16, #tpu.memory_space<vmem>>) attributes {dimension_semantics = [#tpu.dimension_semantics<parallel>, #tpu.dimension_semantics<parallel>], iteration_bounds = array<i64: 2, 1>, scalar_prefetch = 0 : i64, scratch_operands = 0 : i64, tpu.core_type = #tpu.core_type<tc>, window_params = [{transform_indices = @transform_0, window_bounds = array<i64: 1, 8, 32>}, {transform_indices = @transform_1, window_bounds = array<i64: 1, 8, 32>}, {pipeline_mode = #tpu.pipeline_mode<synchronous>, transform_indices = @transform_2, window_bounds = array<i64: 32, 32>}, {pipeline_mode = #tpu.pipeline_mode<synchronous>, transform_indices = @transform_3, window_bounds = array<i64: 1, 32>}, {pipeline_mode = #tpu.pipeline_mode<synchronous>, transform_indices = @transform_4, window_bounds = array<i64: 32, 32>}, {pipeline_mode = #tpu.pipeline_mode<synchronous>, transform_indices = @transform_5, window_bounds = array<i64: 1, 32>}, {transform_indices = @transform_6, window_bounds = array<i64: 1, 8, 32>}, {transform_indices = @transform_7, window_bounds = array<i64: 1, 8, 32>}]} {
    %c0 = arith.constant 0 : index
    %c0_0 = arith.constant 0 : index
    %c0_1 = arith.constant 0 : index
    %0 = vector.load %arg2[%c0, %c0_0, %c0_1] : memref<1x8x32xbf16, #tpu.memory_space<vmem>>, vector<1x8x32xbf16>
    %1 = vector.shape_cast %0 : vector<1x8x32xbf16> to vector<8x32xbf16>
    %c0_2 = arith.constant 0 : index
    %c0_3 = arith.constant 0 : index
    %2 = vector.load %arg4[%c0_2, %c0_3] : memref<32x32xbf16, #tpu.memory_space<vmem>>, vector<32x32xbf16>
    %cst = arith.constant dense<0.000000e+00> : vector<8x32xf32>
    %3 = tpu.matmul %1, %2, %cst {dimension_numbers = #tpu.dot_dimension_numbers<[1], [0], [0], [1], [0, 0, 1, 1], [], []>} : vector<8x32xbf16>, vector<32x32xbf16>, vector<8x32xf32> -> vector<8x32xf32>
    %c0_4 = arith.constant 0 : index
    %c0_5 = arith.constant 0 : index
    %4 = vector.load %arg5[%c0_4, %c0_5] : memref<1x32xf32, #tpu.memory_space<vmem>>, vector<1x32xf32>
    %5 = vector.broadcast %4 : vector<1x32xf32> to vector<8x32xf32>
    %6 = arith.addf %3, %5 : vector<8x32xf32>
    %7 = arith.truncf %6 : vector<8x32xf32> to vector<8x32xbf16>
    %c0_6 = arith.constant 0 : index
    %c0_7 = arith.constant 0 : index
    %c0_8 = arith.constant 0 : index
    %8 = vector.load %arg8[%c0_6, %c0_7, %c0_8] : memref<1x8x32xbf16, #tpu.memory_space<vmem>>, vector<1x8x32xbf16>
    %9 = vector.shape_cast %8 : vector<1x8x32xbf16> to vector<8x32xbf16>
    %10 = vector.shape_cast %7 : vector<8x32xbf16> to vector<1x8x32xbf16>
    tpu.vector_store %arg8[%c0_6, %c0_7, %c0_8], %10 {strides = array<i32>} : memref<1x8x32xbf16, #tpu.memory_space<vmem>>, vector<1x8x32xbf16>,
    %c0_9 = arith.constant 0 : index
    %c0_10 = arith.constant 0 : index
    %c0_11 = arith.constant 0 : index
    %11 = vector.load %arg3[%c0_9, %c0_10, %c0_11] : memref<1x8x32xbf16, #tpu.memory_space<vmem>>, vector<1x8x32xbf16>
    %12 = vector.shape_cast %11 : vector<1x8x32xbf16> to vector<8x32xbf16>
    %c0_12 = arith.constant 0 : index
    %c0_13 = arith.constant 0 : index
    %13 = vector.load %arg6[%c0_12, %c0_13] : memref<32x32xbf16, #tpu.memory_space<vmem>>, vector<32x32xbf16>
    %cst_14 = arith.constant dense<0.000000e+00> : vector<8x32xf32>
    %14 = tpu.matmul %12, %13, %cst_14 {dimension_numbers = #tpu.dot_dimension_numbers<[1], [0], [0], [1], [0, 0, 1, 1], [], []>} : vector<8x32xbf16>, vector<32x32xbf16>, vector<8x32xf32> -> vector<8x32xf32>
    %c0_15 = arith.constant 0 : index
    %c0_16 = arith.constant 0 : index
    %15 = vector.load %arg7[%c0_15, %c0_16] : memref<1x32xf32, #tpu.memory_space<vmem>>, vector<1x32xf32>
    %16 = vector.broadcast %15 : vector<1x32xf32> to vector<8x32xf32>
    %17 = arith.addf %14, %16 : vector<8x32xf32>
    %18 = arith.truncf %17 : vector<8x32xf32> to vector<8x32xbf16>
    %c0_17 = arith.constant 0 : index
    %c0_18 = arith.constant 0 : index
    %c0_19 = arith.constant 0 : index
    %19 = vector.load %arg9[%c0_17, %c0_18, %c0_19] : memref<1x8x32xbf16, #tpu.memory_space<vmem>>, vector<1x8x32xbf16>
    %20 = vector.shape_cast %19 : vector<1x8x32xbf16> to vector<8x32xbf16>
    %21 = vector.shape_cast %18 : vector<8x32xbf16> to vector<1x8x32xbf16>
    tpu.vector_store %arg9[%c0_17, %c0_18, %c0_19], %21 {strides = array<i32>} : memref<1x8x32xbf16, #tpu.memory_space<vmem>>, vector<1x8x32xbf16>,
    return
  }
  func.func @transform_0(%arg0: i32, %arg1: i32) -> (i32, i32, i32) {
    %c0_i32 = arith.constant 0 : i32
    %c0_i32_0 = arith.constant 0 : i32
    return %arg0, %arg1, %c0_i32 : i32, i32, i32
  }
  func.func @transform_1(%arg0: i32, %arg1: i32) -> (i32, i32, i32) {
    %c0_i32 = arith.constant 0 : i32
    %c0_i32_0 = arith.constant 0 : i32
    return %arg0, %arg1, %c0_i32 : i32, i32, i32
  }
  func.func @transform_2(%arg0: i32, %arg1: i32) -> (i32, i32) {
    %c0_i32 = arith.constant 0 : i32
    %c0_i32_0 = arith.constant 0 : i32
    %c0_i32_1 = arith.constant 0 : i32
    return %c0_i32, %c0_i32_0 : i32, i32
  }
  func.func @transform_3(%arg0: i32, %arg1: i32) -> (i32, i32) {
    %c0_i32 = arith.constant 0 : i32
    %c0_i32_0 = arith.constant 0 : i32
    %c0_i32_1 = arith.constant 0 : i32
    return %c0_i32, %c0_i32_0 : i32, i32
  }
  func.func @transform_4(%arg0: i32, %arg1: i32) -> (i32, i32) {
    %c0_i32 = arith.constant 0 : i32
    %c0_i32_0 = arith.constant 0 : i32
    %c0_i32_1 = arith.constant 0 : i32
    return %c0_i32, %c0_i32_0 : i32, i32
  }
  func.func @transform_5(%arg0: i32, %arg1: i32) -> (i32, i32) {
    %c0_i32 = arith.constant 0 : i32
    %c0_i32_0 = arith.constant 0 : i32
    %c0_i32_1 = arith.constant 0 : i32
    return %c0_i32, %c0_i32_0 : i32, i32
  }
  func.func @transform_6(%arg0: i32, %arg1: i32) -> (i32, i32, i32) {
    %c0_i32 = arith.constant 0 : i32
    %c0_i32_0 = arith.constant 0 : i32
    return %arg0, %arg1, %c0_i32 : i32, i32, i32
  }
  func.func @transform_7(%arg0: i32, %arg1: i32) -> (i32, i32, i32) {
    %c0_i32 = arith.constant 0 : i32
    %c0_i32_0 = arith.constant 0 : i32
    return %arg0, %arg1, %c0_i32 : i32, i32, i32
  }
}

</mosaic_0001>

<bundles_post_ra>
// kernel: tpu_custom_call.1
= control target key start
LH: loop header
LB: loop body
LE: loop exit
PB: predicated region body
PF: predicated region fallthrough
CT: control target
= control target key end

     0   :  { %s1412_s0 = inlined_call_operand.hbm [shape: bf16[2,8,32], index: 0, kind: input, shape index: {}]   ;;  %s1413_s1 = inlined_call_operand.hbm [shape: bf16[2,8,32], index: 1, kind: input, shape index: {}]   ;;  %s1414_s2 = inlined_call_operand.hbm [shape: bf16[32,32], index: 2, kind: input, shape index: {}]   ;;  %s1415_s3 = inlined_call_operand.vmem [shape: f32[1,32], index: 3, kind: input, shape index: {}]   ;;  %s1416_s4 = inlined_call_operand.hbm [shape: bf16[32,32], index: 4, kind: input, shape index: {}]   ;;  %s1417_s5 = inlined_call_operand.vmem [shape: f32[1,32], index: 5, kind: input, shape index: {}]   ;;  %s1418_s6 = inlined_call_operand.hbm [shape: bf16[2,8,32], index: 6, kind: output, shape index: {0}]   ;;  %s1419_s7 = inlined_call_operand.hbm [shape: bf16[2,8,32], index: 7, kind: output, shape index: {1}]  }
   0x1   :  { %1422 = sst [smem:[#allocation20_spill]] %s1412_s0 }
   0x2   :  { %1423 = sst [smem:[#allocation21_spill]] %s1413_s1 }
   0x3   :  { %1424 = sst [smem:[#allocation22_spill]] %s1414_s2 }
   0x4   :  { %1425 = sst [smem:[#allocation23_spill]] %s1416_s4 }
   0x5   :  { %13 = vsyncpa [#allocation3], 0 }
   0x6   :  { %15 = vsyncpa [#allocation3 + $0x1], 0 }
   0x7   :  { %16 = vsyncpa [#allocation6], 0 }
   0x8   :  { %18 = vsyncpa [#allocation6 + $0x1], 0 }
   0x9   :  { %19 = vsyncpa [#allocation9], 0 }
   0xa   :  { %20 = vsyncpa [#allocation4], 0 }
   0xb   :  { %22 = vsyncpa [#allocation4 + $0x1], 0 }
   0xc   :  { %23 = vsyncpa [#allocation12], 0 }
   0xd   :  { %25 = vsyncpa [#allocation12 + $0x1], 0  ;;  %s1160_s24 = smov 0   ;;  %s1162_s25 = smov 0  }
   0xe   :  { %s1164_s26 = smov 0   ;;  %s1166_s27 = smov 0  }
   0xf   :  { %s1168_s28 = smov 0   ;;  %s1170_s29 = smov 0  }
  0x10 LB: > { %s1191_s30 = sadd.s32 4294967295, %s1108_s29   ;;  %s725_s8 = sadd.s32 4294967294, %s1108_s29   ;;  %s1108_s29 = sphi %s1170_s29, %s31_s29   ;;  %s1104_s28 = sphi %s1168_s28, %s1449_s28   ;;  %s1100_s27 = sphi %s1166_s27, %s1448_s27   ;;  %s1096_s26 = sphi %s1164_s26, %s1447_s26   ;;  %s1092_s25 = sphi %s1162_s25, %s1446_s25   ;;  %s1088_s24 = sphi %s1160_s24, %s1445_s24  }
  0x11   : > { %p65_p0 = scmp.ne.s32.totalorder %s1092_s25, %s1088_s24  ;;  %p1420_p1 = scmp.eq.s32.totalorder %s1191_s30, 0 }
  0x12   : > { %p209_p3 = scmp.eq.s32.totalorder %s725_s8, 1  ;;  %p726_p5 = scmp.ge.s32.totalorder %s1108_s29, 1 }
  0x13   : > { %p1200_p4 = por %p1420_p1, %p65_p0  ;;  %p244_p7 = scmp.lt.s32.totalorder %s1108_s29, 3 }
  0x14   : > { %p1205_p6 = por %p209_p3, %p65_p0  ;;  %s1110_s12 = smov [#allocation7]  }
  0x15   : > { %p1210_p8 = pnand %p726_p5, %p244_p7  ;;  %s256_s13 = sshll.u32 %s1110_s12, 4  ;;  %s257_s13 = int_to_ptr.vmem [resolvable:$true] %s256_s13 }
  0x16   : > { %s1427_s10 = scalar_select %p1205_p6, 1, 0 }
  0x17   : > { %p793_p9 = pneg %p1210_p8  ;;  %s1111_s15 = smov [#allocation8]  }
  0x18   : > { %s272_s16 = sshll.u32 %s1111_s15, 4  ;;  %s889_s17 = scalar_lea.vmem %s257_s13, 256  ;;  %s273_s16 = int_to_ptr.vmem [resolvable:$true] %s272_s16 }
  0x19   : > { %p1219_p11 = pnand %p793_p9, %p1420_p1  ;;  %p890_p13 = scmp.ne.s32.totalorder %s257_s13, %s889_s17 }
  0x1a   : > { %p897_p5 = scmp.lt.s32.totalorder %s257_s13, %s257_s13  ;;  %p898_p7 = scmp.lt.s32.totalorder %s889_s17, %s889_s17 }
  0x1b   : > { %p880_p12 = pneg %p1219_p11 }
  0x1c   : > { %p899_p10 = por %p898_p7, %p897_p5 }
  0x1d   : > { %p892_p0 = pnand %p890_p13, %p880_p12 }
  0x1f   : > { %p893_p3 = pneg %p892_p0 }
  0x21   : > { %p900_p9 = pnand %p899_p10, %p893_p3 }
  0x23   : > { %903 = shalt.err (!%p900_p9)
}
  0x24   : > { %s1112_s18 = smov 64   ;;  %s1113_s19 = smov 4  }
  0x25   : > { %s1430_s2 = sld [smem:[#allocation22_spill]]  ;;  %s915_s22 = scalar_lea.vmem %s273_s16, 256 }
  0x26   : > { %p916_p1 = scmp.ne.s32.totalorder %s273_s16, %s915_s22  ;;  %p923_p2 = scmp.lt.s32.totalorder %s273_s16, %s273_s16 }
  0x27   : > { %p924_p6 = scmp.lt.s32.totalorder %s915_s22, %s915_s22 }
  0x28   : > { %p918_p13 = pnand %p916_p1, %p880_p12 }
  0x29   : > { %p925_p5 = por %p924_p6, %p923_p2 }
  0x2a   : > { %p919_p0 = pneg %p918_p13 }
  0x2b   : > { %796 = dma.hbm_to_vmem [thread:$0]  (!%p1219_p11), %s1430_s2, 256, %s257_s13, [#allocation6], %s1112_s18, %s1112_s18, %s1113_s19  }
  0x2c   : > { %p926_p10 = pnand %p925_p5, %p919_p0 }
  0x2e   : > { %929 = shalt.err (!%p926_p10)
}
  0x2f   : > { %s1431_s4 = sld [smem:[#allocation23_spill]]  ;;  %s43_s12 = sadd.s32 1, %s1104_s28 }
  0x30   : > { %s52_s13 = sadd.s32 1, %s1096_s26  ;;  %p45_p1 = scmp.ge.s32.totalorder %s43_s12, 2 }
  0x31   : > { %p59_p2 = scmp.ne.s32.totalorder %s1096_s26, %s1092_s25  ;;  %p60_p6 = scmp.eq.s32.totalorder %s1108_s29, 0 }
  0x32   : > { %p816_p12 = scmp.lt.s32.totalorder %s1108_s29, 2  ;;  %s1451_s12 = smov (%p45_p1, %s43_s12), 0 }
  0x33   : > { %1432 = sst [smem:[#allocation19_spill]] %s1451_s12  ;;  %p61_p3 = por %p60_p6, %p59_p2 }
  0x34   : > { %p1433_p7 = scmp.eq.s32.totalorder %s1191_s30, 1  ;;  %s47_s15 = ssub.s32 %s1104_s28, %s1451_s12 }
  0x35   : > { %799 = dma.hbm_to_vmem [thread:$0]  (!%p1219_p11), %s1431_s4, 256, %s273_s16, [#allocation9], %s1112_s18, %s1112_s18, %s1113_s19  }
  0x36   : > { %p1251_p9 = por %p1433_p7, %p59_p2  ;;  %s289_s17 = sand.u32 1, %s1096_s26  }
  0x37   : > { %p50_p13 = scmp.eq.s32.totalorder %s47_s15, 0  ;;  %s730_s16 = sshll.u32 %s289_s17, 2 }
  0x38   : > { %s731_s18 = sshll.u32 %s1104_s28, 6  ;;  %s1435_s0 = sld [smem:[#allocation20_spill]] }
  0x39   : > { %s1260_s19 = scalar_select %p50_p13, %s1096_s26, %s52_s13  }
  0x3a   : > { %s293_s23 = scalar_lea.vmem [#allocation2], %s730_s16  ;;  %p1267_p11 = pnand %p816_p12, %p61_p3 }
  0x3b   : > { %s301_s8 = sshll.u32 %s293_s23, 4  ;;  %s1437_s1 = sld [smem:[#allocation21_spill]]  ;;  %s302_s8 = int_to_ptr.vmem [resolvable:$true] %s301_s8 }
  0x3c   : > { %s290_s13 = scalar_lea.sflag [#allocation3], %s289_s17  ;;  %p932_p0 = pneg %p1267_p11 }
  0x3d   : > { %s943_s20 = scalar_lea.vmem %s302_s8, 64  ;;  %s1114_s21 = smov [#allocation2]  }
  0x3e   : > { %s299_s22 = scalar_lea.hbm %s1435_s0, %s731_s18  ;;  %p944_p5 = scmp.ne.s32.totalorder %s302_s8, %s943_s20 }
  0x3f   : > { %s948_s23 = sshll.u32 %s1114_s21, 4  ;;  %s949_s23 = int_to_ptr.vmem [resolvable:$false] %s948_s23 }
  0x40   : > { %p946_p10 = pnand %p944_p5, %p932_p0  ;;  %s950_s0 = scalar_lea.vmem %s949_s23, 128 }
  0x41   : > { %s1274_s12 = scalar_lea.hbm %s1437_s1, %s731_s18  ;;  %p951_p2 = scmp.lt.s32.totalorder %s302_s8, %s949_s23 }
  0x42   : > { %p947_p1 = pneg %p946_p10  ;;  %p952_p6 = scmp.lt.s32.totalorder %s950_s0, %s943_s20 }
  0x44   : > { %p953_p12 = por %p952_p6, %p951_p2 }
  0x46   : > { %p954_p3 = pnand %p953_p12, %p947_p1 }
  0x48   : > { %957 = shalt.err (!%p954_p3)
}
  0x49   : > { %803 = dma.hbm_to_vmem [thread:$0]  (!%p1267_p11), %s299_s22, 64, %s302_s8, %s290_s13  }
  0x4a   : > { %s308_s4 = sand.u32 1, %s1108_s29   ;;  %s312_s17 = scalar_lea.vmem [#allocation5], %s730_s16 }
  0x4b   : > { %s320_s18 = sshll.u32 %s312_s17, 4  ;;  %s309_s15 = scalar_lea.sflag [#allocation6], %s308_s4  ;;  %s321_s18 = int_to_ptr.vmem [resolvable:$true] %s320_s18 }
  0x4c   : > { %s971_s1 = scalar_lea.vmem %s321_s18, 64  ;;  %s1115_s0 = smov [#allocation5]  }
  0x4d   : > { %p972_p7 = scmp.ne.s32.totalorder %s321_s18, %s971_s1  ;;  %s976_s20 = sshll.u32 %s1115_s0, 4  ;;  %s977_s20 = int_to_ptr.vmem [resolvable:$false] %s976_s20 }
  0x4e   : > { %s978_s21 = scalar_lea.vmem %s977_s20, 128  ;;  %p979_p10 = scmp.lt.s32.totalorder %s321_s18, %s977_s20 }
  0x4f   : > { %p974_p13 = pnand %p972_p7, %p932_p0  ;;  %p980_p1 = scmp.lt.s32.totalorder %s978_s21, %s971_s1 }
  0x51   : > { %p975_p5 = pneg %p974_p13  ;;  %p981_p2 = por %p980_p1, %p979_p10 }
  0x53   : > { %p982_p6 = pnand %p981_p2, %p975_p5 }
  0x55   : > { %985 = shalt.err (!%p982_p6)
}
  0x56   : > { %806 = dma.hbm_to_vmem [thread:$0]  (!%p1267_p11), %s1274_s12, 64, %s321_s18, %s309_s15  }
  0x57   : > { %329 = sbr.rel (%p1210_p8) target bundleno = 345 (0x159), region = 44  ;;  %s1293_s16 = sand.u32 (!%p1210_p8), 1, %s1092_s25  }
  0x58   : > { %s1296_s22 = sshll.u32 (!%p1210_p8), %s1293_s16, 2  ;;  %s332_s1 = scalar_lea.sflag (!%p1210_p8), [#allocation3], %s1293_s16 }
  0x59   : > { %s335_s8 = scalar_lea.vmem (!%p1210_p8), [#allocation2], %s1296_s22 }
  0x5c   : > { %1063 = dma.done.wait (%p1200_p4), %s332_s1, 64  }
  0x5d   : > { %1065 = vsyncadd (%p1200_p4), %s332_s1, 4294967232  ;;  %s340_s2 = sand.u32 1, %s1191_s30   ;;  %s344_s12 = scalar_lea.vmem [#allocation5], %s1296_s22 }
  0x5e   : > { %s341_s11 = scalar_lea.sflag [#allocation6], %s340_s2 }
  0x5f   : > { %1067 = dma.done.wait (%p1200_p4), %s341_s11, 64  }
  0x60   : > { %1069 = vsyncadd (%p1200_p4), %s341_s11, 4294967232  ;;  %p1438_p8 = scmp.eq.s32.totalorder %s1191_s30, 0 }
  0x62   : > { %1071 = dma.done.wait (%p1438_p8), [#allocation6], 256   ;;  %p1439_p11 = pmov %p1438_p8 }
  0x63   : > { %p1440_p0 = pmov %p1438_p8 }
  0x64   : > { %1073 = vsyncadd (%p1439_p11), [#allocation6], 4294967040 }
  0x65   : > { %1075 = dma.done.wait (%p1440_p0), [#allocation9], 256   ;;  %p1441_p12 = pmov %p1440_p0 }
  0x66   : > { %v1116_v0 = vmov 0.0   ;;  %vm1117_vm0 = vmmov 0   ;;  %v874_v1 = vld [vmem:[#allocation7 + $0x8] sm:$0xff]   ;;  %v875_v2 = vld [vmem:[#allocation8 + $0x8] sm:$0xff]   ;;  %v876_v3 = vld [vmem:[#allocation7] sm:$0xff]   ;;  %vm418_vm1 = vcmask 261120  }
  0x67   : > { %1077 = vsyncadd (%p1441_p12), [#allocation9], 4294967040  ;;  %761 = vmatprep.subr.bf16.mxu0 %v1116_v0  ;;  %769 = vmatprep.subr.bf16.mxu1 %v1116_v0  ;;  %v877_v4 = vld [vmem:[#allocation8] sm:$0xff]   ;;  %v465_v6 = vld [vmem:[%s344_s12] sm:$0xf]  ;;  %s751_s4 = sshll.u32 %s1100_s27, 6 }
  0x68   : > { %765 = vmatprep.mubr.msk.bf16.mxu0 %vm1117_vm0, %v1116_v0  ;;  %773 = vmatprep.mubr.msk.bf16.mxu1 %vm1117_vm0, %v1116_v0  ;;  %v394_v5 = vld [vmem:[%s335_s8] sm:$0xf]  ;;  %s385_s17 = scalar_lea.vmem [#allocation10], %s1296_s22  ;;  %s392_s15 = scalar_lea.vmem [#allocation11], %s1296_s22  ;;  %vm463_vm2 = vcmask 257024  }
  0x69   : > { %762 = vmatpush3.bf16.msra.mxu0 %v874_v1  ;;  %770 = vmatpush3.bf16.msra.mxu1 %v875_v2  ;;  %v741_v7 = vld [vmem:[%s1415_s3] ss:$0 sm:$0xff]  ;;  %s554_s18 = sshll.u32 %s385_s17, 4  ;;  %s568_s0 = sshll.u32 %s392_s15, 4  ;;  %s1334_s18 = int_to_ptr.vmem [resolvable:$true] %s554_s18  ;;  %s1341_s0 = int_to_ptr.vmem [resolvable:$true] %s568_s0 }
  0x6a   : > { %763 = vmatprep.subr.bf16.mxu0 %v1116_v0  ;;  %771 = vmatprep.subr.bf16.mxu1 %v1116_v0  ;;  %v745_v8 = vld [vmem:[%s1417_s5] ss:$0 sm:$0xff]  ;;  %s1332_s1 = scalar_lea.hbm %s1418_s6, %s751_s4  ;;  %s1339_s2 = scalar_lea.hbm %s1419_s7, %s751_s4 }
  0x6b   : > { %s535_s11 = scalar_lea.sflag [#allocation4], %s1293_s16  ;;  %s986_s12 = scalar_lea.vmem %s1334_s18, 64 }
  0x6c   : > { %p987_p4 = scmp.ne.s32.totalorder %s1334_s18, %s986_s12  ;;  %s1118_s30 = smov [#allocation10]  }
  0x6d   : > { %764 = vmatpush3.bf16.msra.mxu0 %v876_v3  ;;  %772 = vmatpush3.bf16.msra.mxu1 %v877_v4  ;;  %s990_s9 = sshll.u32 %s1118_s30, 4  ;;  %s991_s9 = int_to_ptr.vmem [resolvable:$false] %s990_s9 }
  0x6e   : > { %p988_p3 = pnand %p987_p4, %p1251_p9  ;;  %s992_s13 = scalar_lea.vmem %s991_s9, 128 }
  0x6f   : > { %p993_p13 = scmp.lt.s32.totalorder %s1334_s18, %s991_s9  ;;  %p994_p5 = scmp.lt.s32.totalorder %s992_s13, %s986_s12 }
  0x70   : > { %766 = vmatmul.mubr.msk.bf16.vlgmr.msra.gmra.mxu0 %vm418_vm1, %v394_v5  ;;  %774 = vmatmul.mubr.msk.bf16.vlgmr.msra.gmra.mxu1 %vm418_vm1, %v465_v6  ;;  %p989_p7 = pneg %p988_p3 }
  0x71   : > { %p995_p10 = por %p994_p5, %p993_p13 }
  0x73   : > { %p996_p1 = pnand %p995_p10, %p989_p7 }
 0x130   : > { %v456_v9 = vpop.f32.mrf.mxu0  ;;  %v526_v11 = vpop.f32.mrf.mxu1 }
 0x131   : > { %v457_v10 = vadd.f32 %v741_v7, %v456_v9  ;;  %v527_v12 = vadd.f32 %v745_v8, %v526_v11 }
 0x132   : > { %v767_v13 = vpop.f32.mrf.mxu0  ;;  %v775_v15 = vpop.f32.mrf.mxu1 }
 0x133   : > { %v462_v14 = vpack.c.bf16 %v457_v10, %v457_v10  ;;  %v532_v16 = vpack.c.bf16 %v527_v12, %v527_v12 }
 0x134   : > { %v459_v17 = vpop.f32.mrf.mxu0  ;;  %v529_v18 = vpop.f32.mrf.mxu1 }
 0x135   : > { %464 = vst.msk [vmem:[%s385_s17] sm:$0xf] %vm463_vm2, %v462_v14 }
 0x136   : > { %v768_v19 = vpop.f32.mrf.mxu0 }
 0x137   : > { %999 = shalt.err (!%p996_p1)
}
 0x138   : > { %s1000_s23 = scalar_lea.hbm %s1332_s1, 64  ;;  %s1004_s20 = scalar_lea.hbm %s1418_s6, 128 }
 0x139   : > { %p1001_p2 = scmp.ne.s32.totalorder %s1332_s1, %s1000_s23  ;;  %p1005_p11 = scmp.lt.s32.totalorder %s1332_s1, %s1418_s6 }
 0x13a   : > { %p1006_p0 = scmp.lt.s32.totalorder %s1004_s20, %s1000_s23 }
 0x13b   : > { %p1002_p6 = pnand %p1001_p2, %p1251_p9 }
 0x13c   : > { %p1007_p12 = por %p1006_p0, %p1005_p11 }
 0x13d   : > { %p1003_p8 = pneg %p1002_p6 }
 0x13f   : > { %p1008_p4 = pnand %p1007_p12, %p1003_p8 }
 0x141   : > { %1011 = shalt.err (!%p1008_p4)
}
 0x142   : > { %789 = dma.vmem_to_hbm [thread:$0]  (%p1251_p9), %s1334_s18, 64, %s1332_s1, %s535_s11   ;;  %533 = vst.msk [vmem:[%s392_s15] sm:$0xf] %vm463_vm2, %v532_v16  ;;  %v776_v20 = vpop.f32.mrf.mxu1 }
 0x143   : > { %s540_s8 = scalar_lea.sflag [#allocation12], %s1293_s16  ;;  %s1012_s12 = scalar_lea.vmem %s1341_s0, 64 }
 0x144   : > { %p1013_p3 = scmp.ne.s32.totalorder %s1341_s0, %s1012_s12  ;;  %s1119_s30 = smov [#allocation11]  }
 0x145   : > { %s1016_s9 = sshll.u32 %s1119_s30, 4  ;;  %s1017_s9 = int_to_ptr.vmem [resolvable:$false] %s1016_s9 }
 0x146   : > { %p1014_p7 = pnand %p1013_p3, %p1251_p9  ;;  %s1018_s13 = scalar_lea.vmem %s1017_s9, 128 }
 0x147   : > { %p1019_p5 = scmp.lt.s32.totalorder %s1341_s0, %s1017_s9  ;;  %p1020_p10 = scmp.lt.s32.totalorder %s1018_s13, %s1012_s12 }
 0x148   : > { %p1015_p13 = pneg %p1014_p7 }
 0x149   : > { %p1021_p1 = por %p1020_p10, %p1019_p5 }
 0x14b   : > { %p1022_p2 = pnand %p1021_p1, %p1015_p13 }
 0x14d   : > { %1025 = shalt.err (!%p1022_p2)
}
 0x14e   : > { %s1026_s22 = scalar_lea.hbm %s1339_s2, 64  ;;  %s1030_s15 = scalar_lea.hbm %s1419_s7, 128 }
 0x14f   : > { %p1027_p6 = scmp.ne.s32.totalorder %s1339_s2, %s1026_s22  ;;  %p1031_p0 = scmp.lt.s32.totalorder %s1339_s2, %s1419_s7 }
 0x150   : > { %p1032_p12 = scmp.lt.s32.totalorder %s1030_s15, %s1026_s22 }
 0x151   : > { %p1028_p8 = pnand %p1027_p6, %p1251_p9 }
 0x152   : > { %p1033_p4 = por %p1032_p12, %p1031_p0 }
 0x153   : > { %p1029_p11 = pneg %p1028_p8 }
 0x155   : > { %p1034_p3 = pnand %p1033_p4, %p1029_p11 }
 0x157   : > { %1037 = shalt.err (!%p1034_p3)
}
 0x158   : > { %790 = dma.vmem_to_hbm [thread:$0]  (%p1251_p9), %s1341_s0, 64, %s1339_s2, %s540_s8  }
 0x159 PF: > { %s580_s23 = sand.u32 1, %s1088_s24   ;;  %p1442_p7 = scmp.ne.s32.totalorder %s1427_s10, 0 }
 0x15a   : > { %p1443_p13 = scmp.ge.s32.totalorder %s1108_s29, 2  ;;  %s581_s4 = scalar_lea.sflag [#allocation4], %s580_s23 }
 0x15c   : > { %p808_p5 = pnand %p1443_p13, %p1442_p7 }
 0x15e   : > { %p809_p10 = pneg %p808_p5 }
 0x160   : > { %1079 = dma.done.wait (%p809_p10), %s581_s4, 64  }
 0x161   : > { %1081 = vsyncadd (%p809_p10), %s581_s4, 4294967232  ;;  %s590_s17 = scalar_lea.sflag [#allocation12], %s580_s23 }
 0x162   : > { %1083 = dma.done.wait (%p809_p10), %s590_s17, 64  }
 0x163   : > { %1085 = vsyncadd (%p809_p10), %s590_s17, 4294967232  ;;  %s31_s29 = sadd.s32 1, %s1108_s29   ;;  %s1444_s14 = sld [smem:[#allocation19_spill]] }
 0x164   : > { %p28_p1 = scmp.ge.s32.totalorder %s31_s29, 4   ;;  %s1445_s24 = smov %s1092_s25 }
 0x165   : > { %s1446_s25 = smov %s1096_s26  ;;  %s1447_s26 = smov %s1260_s19 }
 0x166   : > { %s1448_s27 = smov %s1104_s28  ;;  %30 = sbr.rel (!%p28_p1) target bundleno = 16 (0x10), region = 127 }
 0x169   : > { %s1449_s28 = smov %s1444_s14 }
 0x16b   :  { %595 = vsyncpa [#allocation3], 1 }
 0x16c   :  { %597 = vsyncpa [#allocation3 + $0x1], 1 }
 0x16d   :  { %598 = vsyncpa [#allocation6], 1 }
 0x16e   :  { %600 = vsyncpa [#allocation6 + $0x1], 1 }
 0x16f   :  { %601 = vsyncpa [#allocation9], 1 }
 0x170   :  { %602 = vsyncpa [#allocation4], 1 }
 0x171   :  { %604 = vsyncpa [#allocation4 + $0x1], 1 }
 0x172   :  { %605 = vsyncpa [#allocation12], 1 }
 0x173   :  { %607 = vsyncpa [#allocation12 + $0x1], 1 }

// kernel: tpu_custom_call.1
= control target key start
LH: loop header
LB: loop body
LE: loop exit
PB: predicated region body
PF: predicated region fallthrough
CT: control target
= control target key end

     0   :  { %s1412_s0 = inlined_call_operand.hbm [shape: bf16[2,8,32], index: 0, kind: input, shape index: {}]   ;;  %s1413_s1 = inlined_call_operand.hbm [shape: bf16[2,8,32], index: 1, kind: input, shape index: {}]   ;;  %s1414_s2 = inlined_call_operand.hbm [shape: bf16[32,32], index: 2, kind: input, shape index: {}]   ;;  %s1415_s3 = inlined_call_operand.vmem [shape: f32[1,32], index: 3, kind: input, shape index: {}]   ;;  %s1416_s4 = inlined_call_operand.hbm [shape: bf16[32,32], index: 4, kind: input, shape index: {}]   ;;  %s1417_s5 = inlined_call_operand.vmem [shape: f32[1,32], index: 5, kind: input, shape index: {}]   ;;  %s1418_s6 = inlined_call_operand.hbm [shape: bf16[2,8,32], index: 6, kind: output, shape index: {0}]   ;;  %s1419_s7 = inlined_call_operand.hbm [shape: bf16[2,8,32], index: 7, kind: output, shape index: {1}]  }
   0x1   :  { %1422 = sst [smem:[#allocation20_spill]] %s1412_s0 }
   0x2   :  { %1423 = sst [smem:[#allocation21_spill]] %s1413_s1 }
   0x3   :  { %1424 = sst [smem:[#allocation22_spill]] %s1414_s2 }
   0x4   :  { %1425 = sst [smem:[#allocation23_spill]] %s1416_s4 }
   0x5   :  { %13 = vsyncpa [#allocation3], 0 }
   0x6   :  { %15 = vsyncpa [#allocation3 + $0x1], 0 }
   0x7   :  { %16 = vsyncpa [#allocation6], 0 }
   0x8   :  { %18 = vsyncpa [#allocation6 + $0x1], 0 }
   0x9   :  { %19 = vsyncpa [#allocation9], 0 }
   0xa   :  { %20 = vsyncpa [#allocation4], 0 }
   0xb   :  { %22 = vsyncpa [#allocation4 + $0x1], 0 }
   0xc   :  { %23 = vsyncpa [#allocation12], 0 }
   0xd   :  { %25 = vsyncpa [#allocation12 + $0x1], 0  ;;  %s1160_s24 = smov 0   ;;  %s1162_s25 = smov 0  }
   0xe   :  { %s1164_s26 = smov 0   ;;  %s1166_s27 = smov 0  }
   0xf   :  { %s1168_s28 = smov 0   ;;  %s1170_s29 = smov 0  }
  0x10 LB: > { %s1191_s30 = sadd.s32 4294967295, %s1108_s29   ;;  %s725_s8 = sadd.s32 4294967294, %s1108_s29   ;;  %s1108_s29 = sphi %s1170_s29, %s31_s29   ;;  %s1104_s28 = sphi %s1168_s28, %s1449_s28   ;;  %s1100_s27 = sphi %s1166_s27, %s1448_s27   ;;  %s1096_s26 = sphi %s1164_s26, %s1447_s26   ;;  %s1092_s25 = sphi %s1162_s25, %s1446_s25   ;;  %s1088_s24 = sphi %s1160_s24, %s1445_s24  }
  0x11   : > { %p65_p0 = scmp.ne.s32.totalorder %s1092_s25, %s1088_s24  ;;  %p1420_p1 = scmp.eq.s32.totalorder %s1191_s30, 0 }
  0x12   : > { %p209_p3 = scmp.eq.s32.totalorder %s725_s8, 1  ;;  %p726_p5 = scmp.ge.s32.totalorder %s1108_s29, 1 }
  0x13   : > { %p1200_p4 = por %p1420_p1, %p65_p0  ;;  %p244_p7 = scmp.lt.s32.totalorder %s1108_s29, 3 }
  0x14   : > { %p1205_p6 = por %p209_p3, %p65_p0  ;;  %s1110_s12 = smov [#allocation7]  }
  0x15   : > { %p1210_p8 = pnand %p726_p5, %p244_p7  ;;  %s256_s13 = sshll.u32 %s1110_s12, 4  ;;  %s257_s13 = int_to_ptr.vmem [resolvable:$true] %s256_s13 }
  0x16   : > { %s1427_s10 = scalar_select %p1205_p6, 1, 0 }
  0x17   : > { %p793_p9 = pneg %p1210_p8  ;;  %s1111_s15 = smov [#allocation8]  }
  0x18   : > { %s272_s16 = sshll.u32 %s1111_s15, 4  ;;  %s889_s17 = scalar_lea.vmem %s257_s13, 256  ;;  %s273_s16 = int_to_ptr.vmem [resolvable:$true] %s272_s16 }
  0x19   : > { %p1219_p11 = pnand %p793_p9, %p1420_p1  ;;  %p890_p13 = scmp.ne.s32.totalorder %s257_s13, %s889_s17 }
  0x1a   : > { %p897_p5 = scmp.lt.s32.totalorder %s257_s13, %s257_s13  ;;  %p898_p7 = scmp.lt.s32.totalorder %s889_s17, %s889_s17 }
  0x1b   : > { %p880_p12 = pneg %p1219_p11 }
  0x1c   : > { %p899_p10 = por %p898_p7, %p897_p5 }
  0x1d   : > { %p892_p0 = pnand %p890_p13, %p880_p12 }
  0x1f   : > { %p893_p3 = pneg %p892_p0 }
  0x21   : > { %p900_p9 = pnand %p899_p10, %p893_p3 }
  0x23   : > { %903 = shalt.err (!%p900_p9)
}
  0x24   : > { %s1112_s18 = smov 64   ;;  %s1113_s19 = smov 4  }
  0x25   : > { %s1430_s2 = sld [smem:[#allocation22_spill]]  ;;  %s915_s22 = scalar_lea.vmem %s273_s16, 256 }
  0x26   : > { %p916_p1 = scmp.ne.s32.totalorder %s273_s16, %s915_s22  ;;  %p923_p2 = scmp.lt.s32.totalorder %s273_s16, %s273_s16 }
  0x27   : > { %p924_p6 = scmp.lt.s32.totalorder %s915_s22, %s915_s22 }
  0x28   : > { %p918_p13 = pnand %p916_p1, %p880_p12 }
  0x29   : > { %p925_p5 = por %p924_p6, %p923_p2 }
  0x2a   : > { %p919_p0 = pneg %p918_p13 }
  0x2b   : > { %796 = dma.hbm_to_vmem [thread:$0]  (!%p1219_p11), %s1430_s2, 256, %s257_s13, [#allocation6], %s1112_s18, %s1112_s18, %s1113_s19  }
  0x2c   : > { %p926_p10 = pnand %p925_p5, %p919_p0 }
  0x2e   : > { %929 = shalt.err (!%p926_p10)
}
  0x2f   : > { %s1431_s4 = sld [smem:[#allocation23_spill]]  ;;  %s43_s12 = sadd.s32 1, %s1104_s28 }
  0x30   : > { %s52_s13 = sadd.s32 1, %s1096_s26  ;;  %p45_p1 = scmp.ge.s32.totalorder %s43_s12, 2 }
  0x31   : > { %p59_p2 = scmp.ne.s32.totalorder %s1096_s26, %s1092_s25  ;;  %p60_p6 = scmp.eq.s32.totalorder %s1108_s29, 0 }
  0x32   : > { %p816_p12 = scmp.lt.s32.totalorder %s1108_s29, 2  ;;  %s1451_s12 = smov (%p45_p1, %s43_s12), 0 }
  0x33   : > { %1432 = sst [smem:[#allocation19_spill]] %s1451_s12  ;;  %p61_p3 = por %p60_p6, %p59_p2 }
  0x34   : > { %p1433_p7 = scmp.eq.s32.totalorder %s1191_s30, 1  ;;  %s47_s15 = ssub.s32 %s1104_s28, %s1451_s12 }
  0x35   : > { %799 = dma.hbm_to_vmem [thread:$0]  (!%p1219_p11), %s1431_s4, 256, %s273_s16, [#allocation9], %s1112_s18, %s1112_s18, %s1113_s19  }
  0x36   : > { %p1251_p9 = por %p1433_p7, %p59_p2  ;;  %s289_s17 = sand.u32 1, %s1096_s26  }
  0x37   : > { %p50_p13 = scmp.eq.s32.totalorder %s47_s15, 0  ;;  %s730_s16 = sshll.u32 %s289_s17, 2 }
  0x38   : > { %s731_s18 = sshll.u32 %s1104_s28, 6  ;;  %s1435_s0 = sld [smem:[#allocation20_spill]] }
  0x39   : > { %s1260_s19 = scalar_select %p50_p13, %s1096_s26, %s52_s13  }
  0x3a   : > { %s293_s23 = scalar_lea.vmem [#allocation2], %s730_s16  ;;  %p1267_p11 = pnand %p816_p12, %p61_p3 }
  0x3b   : > { %s301_s8 = sshll.u32 %s293_s23, 4  ;;  %s1437_s1 = sld [smem:[#allocation21_spill]]  ;;  %s302_s8 = int_to_ptr.vmem [resolvable:$true] %s301_s8 }
  0x3c   : > { %s290_s13 = scalar_lea.sflag [#allocation3], %s289_s17  ;;  %p932_p0 = pneg %p1267_p11 }
  0x3d   : > { %s943_s20 = scalar_lea.vmem %s302_s8, 64  ;;  %s1114_s21 = smov [#allocation2]  }
  0x3e   : > { %s299_s22 = scalar_lea.hbm %s1435_s0, %s731_s18  ;;  %p944_p5 = scmp.ne.s32.totalorder %s302_s8, %s943_s20 }
  0x3f   : > { %s948_s23 = sshll.u32 %s1114_s21, 4  ;;  %s949_s23 = int_to_ptr.vmem [resolvable:$false] %s948_s23 }
  0x40   : > { %p946_p10 = pnand %p944_p5, %p932_p0  ;;  %s950_s0 = scalar_lea.vmem %s949_s23, 128 }
  0x41   : > { %s1274_s12 = scalar_lea.hbm %s1437_s1, %s731_s18  ;;  %p951_p2 = scmp.lt.s32.totalorder %s302_s8, %s949_s23 }
  0x42   : > { %p947_p1 = pneg %p946_p10  ;;  %p952_p6 = scmp.lt.s32.totalorder %s950_s0, %s943_s20 }
  0x44   : > { %p953_p12 = por %p952_p6, %p951_p2 }
  0x46   : > { %p954_p3 = pnand %p953_p12, %p947_p1 }
  0x48   : > { %957 = shalt.err (!%p954_p3)
}
  0x49   : > { %803 = dma.hbm_to_vmem [thread:$0]  (!%p1267_p11), %s299_s22, 64, %s302_s8, %s290_s13  }
  0x4a   : > { %s308_s4 = sand.u32 1, %s1108_s29   ;;  %s312_s17 = scalar_lea.vmem [#allocation5], %s730_s16 }
  0x4b   : > { %s320_s18 = sshll.u32 %s312_s17, 4  ;;  %s309_s15 = scalar_lea.sflag [#allocation6], %s308_s4  ;;  %s321_s18 = int_to_ptr.vmem [resolvable:$true] %s320_s18 }
  0x4c   : > { %s971_s1 = scalar_lea.vmem %s321_s18, 64  ;;  %s1115_s0 = smov [#allocation5]  }
  0x4d   : > { %p972_p7 = scmp.ne.s32.totalorder %s321_s18, %s971_s1  ;;  %s976_s20 = sshll.u32 %s1115_s0, 4  ;;  %s977_s20 = int_to_ptr.vmem [resolvable:$false] %s976_s20 }
  0x4e   : > { %s978_s21 = scalar_lea.vmem %s977_s20, 128  ;;  %p979_p10 = scmp.lt.s32.totalorder %s321_s18, %s977_s20 }
  0x4f   : > { %p974_p13 = pnand %p972_p7, %p932_p0  ;;  %p980_p1 = scmp.lt.s32.totalorder %s978_s21, %s971_s1 }
  0x51   : > { %p975_p5 = pneg %p974_p13  ;;  %p981_p2 = por %p980_p1, %p979_p10 }
  0x53   : > { %p982_p6 = pnand %p981_p2, %p975_p5 }
  0x55   : > { %985 = shalt.err (!%p982_p6)
}
  0x56   : > { %806 = dma.hbm_to_vmem [thread:$0]  (!%p1267_p11), %s1274_s12, 64, %s321_s18, %s309_s15  }
  0x57   : > { %329 = sbr.rel (%p1210_p8) target bundleno = 345 (0x159), region = 44  ;;  %s1293_s16 = sand.u32 (!%p1210_p8), 1, %s1092_s25  }
  0x58   : > { %s1296_s22 = sshll.u32 (!%p1210_p8), %s1293_s16, 2  ;;  %s332_s1 = scalar_lea.sflag (!%p1210_p8), [#allocation3], %s1293_s16 }
  0x59   : > { %s335_s8 = scalar_lea.vmem (!%p1210_p8), [#allocation2], %s1296_s22 }
  0x5c   : > { %1063 = dma.done.wait (%p1200_p4), %s332_s1, 64  }
  0x5d   : > { %1065 = vsyncadd (%p1200_p4), %s332_s1, 4294967232  ;;  %s340_s2 = sand.u32 1, %s1191_s30   ;;  %s344_s12 = scalar_lea.vmem [#allocation5], %s1296_s22 }
  0x5e   : > { %s341_s11 = scalar_lea.sflag [#allocation6], %s340_s2 }
  0x5f   : > { %1067 = dma.done.wait (%p1200_p4), %s341_s11, 64  }
  0x60   : > { %1069 = vsyncadd (%p1200_p4), %s341_s11, 4294967232  ;;  %p1438_p8 = scmp.eq.s32.totalorder %s1191_s30, 0 }
  0x62   : > { %1071 = dma.done.wait (%p1438_p8), [#allocation6], 256   ;;  %p1439_p11 = pmov %p1438_p8 }
  0x63   : > { %p1440_p0 = pmov %p1438_p8 }
  0x64   : > { %1073 = vsyncadd (%p1439_p11), [#allocation6], 4294967040 }
  0x65   : > { %1075 = dma.done.wait (%p1440_p0), [#allocation9], 256   ;;  %p1441_p12 = pmov %p1440_p0 }
  0x66   : > { %v1116_v0 = vmov 0.0   ;;  %vm1117_vm0 = vmmov 0   ;;  %v874_v1 = vld [vmem:[#allocation7 + $0x8] sm:$0xff]   ;;  %v875_v2 = vld [vmem:[#allocation8 + $0x8] sm:$0xff]   ;;  %v876_v3 = vld [vmem:[#allocation7] sm:$0xff]   ;;  %vm418_vm1 = vcmask 261120  }
  0x67   : > { %1077 = vsyncadd (%p1441_p12), [#allocation9], 4294967040  ;;  %761 = vmatprep.subr.bf16.mxu0 %v1116_v0  ;;  %769 = vmatprep.subr.bf16.mxu1 %v1116_v0  ;;  %v877_v4 = vld [vmem:[#allocation8] sm:$0xff]   ;;  %v465_v6 = vld [vmem:[%s344_s12] sm:$0xf]  ;;  %s751_s4 = sshll.u32 %s1100_s27, 6 }
  0x68   : > { %765 = vmatprep.mubr.msk.bf16.mxu0 %vm1117_vm0, %v1116_v0  ;;  %773 = vmatprep.mubr.msk.bf16.mxu1 %vm1117_vm0, %v1116_v0  ;;  %v394_v5 = vld [vmem:[%s335_s8] sm:$0xf]  ;;  %s385_s17 = scalar_lea.vmem [#allocation10], %s1296_s22  ;;  %s392_s15 = scalar_lea.vmem [#allocation11], %s1296_s22  ;;  %vm463_vm2 = vcmask 257024  }
  0x69   : > { %762 = vmatpush3.bf16.msra.mxu0 %v874_v1  ;;  %770 = vmatpush3.bf16.msra.mxu1 %v875_v2  ;;  %v741_v7 = vld [vmem:[%s1415_s3] ss:$0 sm:$0xff]  ;;  %s554_s18 = sshll.u32 %s385_s17, 4  ;;  %s568_s0 = sshll.u32 %s392_s15, 4  ;;  %s1334_s18 = int_to_ptr.vmem [resolvable:$true] %s554_s18  ;;  %s1341_s0 = int_to_ptr.vmem [resolvable:$true] %s568_s0 }
  0x6a   : > { %763 = vmatprep.subr.bf16.mxu0 %v1116_v0  ;;  %771 = vmatprep.subr.bf16.mxu1 %v1116_v0  ;;  %v745_v8 = vld [vmem:[%s1417_s5] ss:$0 sm:$0xff]  ;;  %s1332_s1 = scalar_lea.hbm %s1418_s6, %s751_s4  ;;  %s1339_s2 = scalar_lea.hbm %s1419_s7, %s751_s4 }
  0x6b   : > { %s535_s11 = scalar_lea.sflag [#allocation4], %s1293_s16  ;;  %s986_s12 = scalar_lea.vmem %s1334_s18, 64 }
  0x6c   : > { %p987_p4 = scmp.ne.s32.totalorder %s1334_s18, %s986_s12  ;;  %s1118_s30 = smov [#allocation10]  }
  0x6d   : > { %764 = vmatpush3.bf16.msra.mxu0 %v876_v3  ;;  %772 = vmatpush3.bf16.msra.mxu1 %v877_v4  ;;  %s990_s9 = sshll.u32 %s1118_s30, 4  ;;  %s991_s9 = int_to_ptr.vmem [resolvable:$false] %s990_s9 }
  0x6e   : > { %p988_p3 = pnand %p987_p4, %p1251_p9  ;;  %s992_s13 = scalar_lea.vmem %s991_s9, 128 }
  0x6f   : > { %p993_p13 = scmp.lt.s32.totalorder %s1334_s18, %s991_s9  ;;  %p994_p5 = scmp.lt.s32.totalorder %s992_s13, %s986_s12 }
  0x70   : > { %766 = vmatmul.mubr.msk.bf16.vlgmr.msra.gmra.mxu0 %vm418_vm1, %v394_v5  ;;  %774 = vmatmul.mubr.msk.bf16.vlgmr.msra.gmra.mxu1 %vm418_vm1, %v465_v6  ;;  %p989_p7 = pneg %p988_p3 }
  0x71   : > { %p995_p10 = por %p994_p5, %p993_p13 }
  0x73   : > { %p996_p1 = pnand %p995_p10, %p989_p7 }
 0x130   : > { %v456_v9 = vpop.f32.mrf.mxu0  ;;  %v526_v11 = vpop.f32.mrf.mxu1 }
 0x131   : > { %v457_v10 = vadd.f32 %v741_v7, %v456_v9  ;;  %v527_v12 = vadd.f32 %v745_v8, %v526_v11 }
 0x132   : > { %v767_v13 = vpop.f32.mrf.mxu0  ;;  %v775_v15 = vpop.f32.mrf.mxu1 }
 0x133   : > { %v462_v14 = vpack.c.bf16 %v457_v10, %v457_v10  ;;  %v532_v16 = vpack.c.bf16 %v527_v12, %v527_v12 }
 0x134   : > { %v459_v17 = vpop.f32.mrf.mxu0  ;;  %v529_v18 = vpop.f32.mrf.mxu1 }
 0x135   : > { %464 = vst.msk [vmem:[%s385_s17] sm:$0xf] %vm463_vm2, %v462_v14 }
 0x136   : > { %v768_v19 = vpop.f32.mrf.mxu0 }
 0x137   : > { %999 = shalt.err (!%p996_p1)
}
 0x138   : > { %s1000_s23 = scalar_lea.hbm %s1332_s1, 64  ;;  %s1004_s20 = scalar_lea.hbm %s1418_s6, 128 }
 0x139   : > { %p1001_p2 = scmp.ne.s32.totalorder %s1332_s1, %s1000_s23  ;;  %p1005_p11 = scmp.lt.s32.totalorder %s1332_s1, %s1418_s6 }
 0x13a   : > { %p1006_p0 = scmp.lt.s32.totalorder %s1004_s20, %s1000_s23 }
 0x13b   : > { %p1002_p6 = pnand %p1001_p2, %p1251_p9 }
 0x13c   : > { %p1007_p12 = por %p1006_p0, %p1005_p11 }
 0x13d   : > { %p1003_p8 = pneg %p1002_p6 }
 0x13f   : > { %p1008_p4 = pnand %p1007_p12, %p1003_p8 }
 0x141   : > { %1011 = shalt.err (!%p1008_p4)
}
 0x142   : > { %789 = dma.vmem_to_hbm [thread:$0]  (%p1251_p9), %s1334_s18, 64, %s1332_s1, %s535_s11   ;;  %533 = vst.msk [vmem:[%s392_s15] sm:$0xf] %vm463_vm2, %v532_v16  ;;  %v776_v20 = vpop.f32.mrf.mxu1 }
 0x143   : > { %s540_s8 = scalar_lea.sflag [#allocation12], %s1293_s16  ;;  %s1012_s12 = scalar_lea.vmem %s1341_s0, 64 }
 0x144   : > { %p1013_p3 = scmp.ne.s32.totalorder %s1341_s0, %s1012_s12  ;;  %s1119_s30 = smov [#allocation11]  }
 0x145   : > { %s1016_s9 = sshll.u32 %s1119_s30, 4  ;;  %s1017_s9 = int_to_ptr.vmem [resolvable:$false] %s1016_s9 }
 0x146   : > { %p1014_p7 = pnand %p1013_p3, %p1251_p9  ;;  %s1018_s13 = scalar_lea.vmem %s1017_s9, 128 }
 0x147   : > { %p1019_p5 = scmp.lt.s32.totalorder %s1341_s0, %s1017_s9  ;;  %p1020_p10 = scmp.lt.s32.totalorder %s1018_s13, %s1012_s12 }
 0x148   : > { %p1015_p13 = pneg %p1014_p7 }
 0x149   : > { %p1021_p1 = por %p1020_p10, %p1019_p5 }
 0x14b   : > { %p1022_p2 = pnand %p1021_p1, %p1015_p13 }
 0x14d   : > { %1025 = shalt.err (!%p1022_p2)
}
 0x14e   : > { %s1026_s22 = scalar_lea.hbm %s1339_s2, 64  ;;  %s1030_s15 = scalar_lea.hbm %s1419_s7, 128 }
 0x14f   : > { %p1027_p6 = scmp.ne.s32.totalorder %s1339_s2, %s1026_s22  ;;  %p1031_p0 = scmp.lt.s32.totalorder %s1339_s2, %s1419_s7 }
 0x150   : > { %p1032_p12 = scmp.lt.s32.totalorder %s1030_s15, %s1026_s22 }
 0x151   : > { %p1028_p8 = pnand %p1027_p6, %p1251_p9 }
 0x152   : > { %p1033_p4 = por %p1032_p12, %p1031_p0 }
 0x153   : > { %p1029_p11 = pneg %p1028_p8 }
 0x155   : > { %p1034_p3 = pnand %p1033_p4, %p1029_p11 }
 0x157   : > { %1037 = shalt.err (!%p1034_p3)
}
 0x158   : > { %790 = dma.vmem_to_hbm [thread:$0]  (%p1251_p9), %s1341_s0, 64, %s1339_s2, %s540_s8  }
 0x159 PF: > { %s580_s23 = sand.u32 1, %s1088_s24   ;;  %p1442_p7 = scmp.ne.s32.totalorder %s1427_s10, 0 }
 0x15a   : > { %p1443_p13 = scmp.ge.s32.totalorder %s1108_s29, 2  ;;  %s581_s4 = scalar_lea.sflag [#allocation4], %s580_s23 }
 0x15c   : > { %p808_p5 = pnand %p1443_p13, %p1442_p7 }
 0x15e   : > { %p809_p10 = pneg %p808_p5 }
 0x160   : > { %1079 = dma.done.wait (%p809_p10), %s581_s4, 64  }
 0x161   : > { %1081 = vsyncadd (%p809_p10), %s581_s4, 4294967232  ;;  %s590_s17 = scalar_lea.sflag [#allocation12], %s580_s23 }
 0x162   : > { %1083 = dma.done.wait (%p809_p10), %s590_s17, 64  }
 0x163   : > { %1085 = vsyncadd (%p809_p10), %s590_s17, 4294967232  ;;  %s31_s29 = sadd.s32 1, %s1108_s29   ;;  %s1444_s14 = sld [smem:[#allocation19_spill]] }
 0x164   : > { %p28_p1 = scmp.ge.s32.totalorder %s31_s29, 4   ;;  %s1445_s24 = smov %s1092_s25 }
 0x165   : > { %s1446_s25 = smov %s1096_s26  ;;  %s1447_s26 = smov %s1260_s19 }
 0x166   : > { %s1448_s27 = smov %s1104_s28  ;;  %30 = sbr.rel (!%p28_p1) target bundleno = 16 (0x10), region = 127 }
 0x169   : > { %s1449_s28 = smov %s1444_s14 }
 0x16b   :  { %595 = vsyncpa [#allocation3], 1 }
 0x16c   :  { %597 = vsyncpa [#allocation3 + $0x1], 1 }
 0x16d   :  { %598 = vsyncpa [#allocation6], 1 }
 0x16e   :  { %600 = vsyncpa [#allocation6 + $0x1], 1 }
 0x16f   :  { %601 = vsyncpa [#allocation9], 1 }
 0x170   :  { %602 = vsyncpa [#allocation4], 1 }
 0x171   :  { %604 = vsyncpa [#allocation4 + $0x1], 1 }
 0x172   :  { %605 = vsyncpa [#allocation12], 1 }
 0x173   :  { %607 = vsyncpa [#allocation12 + $0x1], 1 }

</bundles_post_ra>
